<compile_context>
chip_gen: v5e
topology: v5e:2x2
jax: 0.10.0
libtpu: 0.0.40
codegen_flags: <defaults>
</compile_context>

<pallas_src>
import jax
import jax.numpy as jnp
from jax.experimental import pallas as pl
from jax.experimental.pallas import tpu as pltpu


def _gated_fusion_kernel(w_ref, b_ref, *rest):
    """One (batch, channel-tile) block per grid step.

    w_ref  : (L, S)        VMEM — fc_gate weights (one row per layer), resident
    b_ref  : (L,)          SMEM — fc_gate biases
    x_refs : L x (1, S, TC) VMEM — layer outputs in native (B, S, C) layout
    out_ref: (1, S, TC)    VMEM — fused output, native layout (no transpose)
    """
    *x_refs, out_ref = rest
    L = len(x_refs)

    w = w_ref[...].astype(jnp.float32)                      # (L, S), tiny

    # Stream layers: accumulate X = sum x_i, Y = sum g_i*x_i, G = sum g_i.
    X = None
    Y = None
    G = None
    for i in range(L):                                      # L small & static
        xi = x_refs[i][0].astype(jnp.float32)               # (S, TC)
        wi = w[i][:, None]                                  # (S, 1)
        # gate_i[c] = sigmoid(sum_s x_i[s, c] * w_i[s] + b_i)  -> (1, TC)
        dot = jnp.sum(xi * wi, axis=0, keepdims=True)       # reduce over S
        gi = jax.nn.sigmoid(dot + b_ref[i])                 # EUP; (1, TC)
        gx = gi * xi                                        # (S, TC)
        if i == 0:
            X, Y, G = xi, gx, gi
        else:
            X = X + xi
            Y = Y + gx
            G = G + gi

    # Exact collapse of sum_{i<j} 0.5*(g_i+g_j)*(x_i+x_j).
    fused = 0.5 * (float(L - 2) * Y + G * X)                # (S, TC)
    # TODO(synk): reference applies self.fc_output(fused) but discards the
    # result, so it is intentionally not computed here.
    out_ref[0] = fused.astype(out_ref.dtype)


def _pick_channel_tile(C, S, L, itemsize, budget_bytes=10 << 20):
    """Largest lane-dense channel tile whose double-buffered footprint fits."""
    for tc in (2048, 1024, 512, 256, 128):
        if C % tc == 0:
            per_step = 2 * (L + 1) * S * tc * itemsize      # L inputs + 1 out, 2 bufs
            if per_step <= budget_bytes:
                return tc
    if C % 128 == 0:
        return 128
    return C  # C not a multiple of 128: fall back to full-extent block


def gated_fusion_dynamic(layer_outputs, w_gate, b_gate):
    """layer_outputs: list of L arrays of shape (B, S, C). Returns (B, S, C)."""
    L = len(layer_outputs)
    assert L > 1, "layer_num must be greater than 1"
    B, S, C = layer_outputs[0].shape
    dtype = layer_outputs[0].dtype
    itemsize = max(jnp.dtype(dtype).itemsize, 4)            # f32 accum worst case
    TC = _pick_channel_tile(C, S, L, itemsize)
    grid = (B, C // TC)

    # Conservative scoped-VMEM request: covers the double-buffered tiles plus
    # the resident gate weights, capped well below v7x's 64 MiB physical VMEM.
    per_step = 2 * (L + 1) * S * TC * itemsize + L * S * itemsize + 4096
    vmem_limit = int(min(max(int(per_step * 1.25), 32 << 20), 48 << 20))

    x_spec = pl.BlockSpec((1, S, TC), lambda b, c: (b, 0, c))
    in_specs = [
        pl.BlockSpec((L, S), lambda b, c: (0, 0)),               # w_gate (resident)
        pl.BlockSpec(memory_space=pltpu.MemorySpace.SMEM),       # b_gate
    ] + [x_spec] * L

    return pl.pallas_call(
        _gated_fusion_kernel,
        grid=grid,
        in_specs=in_specs,
        out_specs=pl.BlockSpec((1, S, TC), lambda b, c: (b, 0, c)),
        out_shape=jax.ShapeDtypeStruct((B, S, C), dtype),
        compiler_params=pltpu.CompilerParams(
            dimension_semantics=("parallel", "parallel"),
            vmem_limit_bytes=vmem_limit),
    )(w_gate, b_gate, *layer_outputs)


def _reference_jax(layer_outputs, w_gate, b_gate):
    """Pure-JAX reference mirroring the PyTorch forward (pairwise form)."""
    L = len(layer_outputs)
    xs = [jnp.transpose(x, (0, 2, 1)) for x in layer_outputs]      # (B, C, S)
    gates = [jax.nn.sigmoid(xs[i] @ w_gate[i][:, None] + b_gate[i])
             for i in range(L)]                                    # (B, C, 1)
    fused = jnp.zeros_like(xs[0])
    for i in range(L):
        for j in range(i + 1, L):
            fused = fused + 0.5 * (gates[i] + gates[j]) * (xs[i] + xs[j])
    return jnp.transpose(fused, (0, 2, 1))                         # (B, S, C)


if __name__ == "__main__":
    # Small, deterministic shapes consistent with the module.
    B, S, C = 2, 8, 4          # batch, seq_len, channels
    layer_num = 3

    key = jax.random.PRNGKey(0)
    keys = jax.random.split(key, layer_num + 3)

    # Inputs: layer_num tensors of shape (B, S, C)
    layer_outputs = [
        jax.random.normal(keys[i], (B, S, C), dtype=jnp.float32)
        for i in range(layer_num)
    ]

    # fc_gate[i]: Linear(seq_len, 1) -> weight (1, S), bias (1,). Stacked:
    w_gate = 0.1 * jax.random.normal(keys[layer_num], (layer_num, S),
                                     dtype=jnp.float32)
    b_gate = 0.1 * jax.random.normal(keys[layer_num + 1], (layer_num,),
                                     dtype=jnp.float32)
    # fc_output: Linear(S, S) — its result is discarded in the reference
    # forward, so it does not participate in the kernel output.
    _w_out = 0.1 * jax.random.normal(keys[layer_num + 2], (S, S),
                                     dtype=jnp.float32)

    out = gated_fusion_dynamic(layer_outputs, w_gate, b_gate)
    out = jax.block_until_ready(out)

    ref = _reference_jax(layer_outputs, w_gate, b_gate)
    assert out.shape == (B, S, C), out.shape
    assert jnp.allclose(out, ref, atol=1e-4, rtol=1e-4), "mismatch vs reference"

    print("KERNEL_OK")
</pallas_src>

<mosaic_0001>
module attributes {stable_mosaic.version = 11 : i64} {
  func.func @_gated_fusion_kernel(%arg0: i32, %arg1: i32, %arg2: memref<3x8xf32, #tpu.memory_space<vmem>>, %arg3: memref<3xf32, #tpu.memory_space<smem>>, %arg4: memref<1x8x4xf32, #tpu.memory_space<vmem>>, %arg5: memref<1x8x4xf32, #tpu.memory_space<vmem>>, %arg6: memref<1x8x4xf32, #tpu.memory_space<vmem>>, %arg7: memref<1x8x4xf32, #tpu.memory_space<vmem>>) attributes {dimension_semantics = [#tpu.dimension_semantics<parallel>, #tpu.dimension_semantics<parallel>], iteration_bounds = array<i64: 2, 1>, scalar_prefetch = 0 : i64, scratch_operands = 0 : i64, tpu.core_type = #tpu.core_type<tc>, window_params = [{pipeline_mode = #tpu.pipeline_mode<synchronous>, transform_indices = @transform_0, window_bounds = array<i64: 3, 8>}, {transform_indices = @transform_1, window_bounds = array<i64: 3>}, {transform_indices = @transform_2, window_bounds = array<i64: 1, 8, 4>}, {transform_indices = @transform_3, window_bounds = array<i64: 1, 8, 4>}, {transform_indices = @transform_4, window_bounds = array<i64: 1, 8, 4>}, {transform_indices = @transform_5, window_bounds = array<i64: 1, 8, 4>}]} {
    %c0 = arith.constant 0 : index
    %c0_0 = arith.constant 0 : index
    %0 = vector.load %arg2[%c0, %c0_0] : memref<3x8xf32, #tpu.memory_space<vmem>>, vector<3x8xf32>
    %c0_1 = arith.constant 0 : index
    %c0_2 = arith.constant 0 : index
    %c0_3 = arith.constant 0 : index
    %1 = vector.load %arg4[%c0_1, %c0_2, %c0_3] : memref<1x8x4xf32, #tpu.memory_space<vmem>>, vector<1x8x4xf32>
    %2 = vector.shape_cast %1 : vector<1x8x4xf32> to vector<8x4xf32>
    %3 = vector.extract_strided_slice %0 {offsets = [0, 0], sizes = [1, 8], strides = [1, 1]} : vector<3x8xf32> to vector<1x8xf32>
    %4 = vector.shape_cast %3 : vector<1x8xf32> to vector<8xf32>
    %5 = vector.shape_cast %4 : vector<8xf32> to vector<8x1xf32>
    %6 = vector.broadcast %5 : vector<8x1xf32> to vector<8x4xf32>
    %7 = arith.mulf %2, %6 : vector<8x4xf32>
    %cst = arith.constant dense<0.000000e+00> : vector<4xf32>
    %8 = vector.multi_reduction <add>, %7, %cst [0] : vector<8x4xf32> to vector<4xf32>
    %9 = vector.shape_cast %8 : vector<4xf32> to vector<1x4xf32>
    %c0_4 = arith.constant 0 : index
    %10 = memref.load %arg3[%c0_4] : memref<3xf32, #tpu.memory_space<smem>>
    %11 = vector.broadcast %10 : f32 to vector<1x4xf32>
    %12 = arith.addf %9, %11 : vector<1x4xf32>
    %13 = arith.negf %12 : vector<1x4xf32>
    %14 = math.exp %13 : vector<1x4xf32>
    %cst_5 = arith.constant 1.000000e+00 : f32
    %15 = vector.broadcast %cst_5 : f32 to vector<1x4xf32>
    %16 = arith.addf %15, %14 : vector<1x4xf32>
    %17 = arith.divf %15, %16 : vector<1x4xf32>
    %18 = vector.broadcast %17 : vector<1x4xf32> to vector<8x4xf32>
    %19 = arith.mulf %18, %2 : vector<8x4xf32>
    %c0_6 = arith.constant 0 : index
    %c0_7 = arith.constant 0 : index
    %c0_8 = arith.constant 0 : index
    %20 = vector.load %arg5[%c0_6, %c0_7, %c0_8] : memref<1x8x4xf32, #tpu.memory_space<vmem>>, vector<1x8x4xf32>
    %21 = vector.shape_cast %20 : vector<1x8x4xf32> to vector<8x4xf32>
    %22 = vector.extract_strided_slice %0 {offsets = [1, 0], sizes = [1, 8], strides = [1, 1]} : vector<3x8xf32> to vector<1x8xf32>
    %23 = vector.shape_cast %22 : vector<1x8xf32> to vector<8xf32>
    %24 = vector.shape_cast %23 : vector<8xf32> to vector<8x1xf32>
    %25 = vector.broadcast %24 : vector<8x1xf32> to vector<8x4xf32>
    %26 = arith.mulf %21, %25 : vector<8x4xf32>
    %cst_9 = arith.constant dense<0.000000e+00> : vector<4xf32>
    %27 = vector.multi_reduction <add>, %26, %cst_9 [0] : vector<8x4xf32> to vector<4xf32>
    %28 = vector.shape_cast %27 : vector<4xf32> to vector<1x4xf32>
    %c1 = arith.constant 1 : index
    %29 = memref.load %arg3[%c1] : memref<3xf32, #tpu.memory_space<smem>>
    %30 = vector.broadcast %29 : f32 to vector<1x4xf32>
    %31 = arith.addf %28, %30 : vector<1x4xf32>
    %32 = arith.negf %31 : vector<1x4xf32>
    %33 = math.exp %32 : vector<1x4xf32>
    %cst_10 = arith.constant 1.000000e+00 : f32
    %34 = vector.broadcast %cst_10 : f32 to vector<1x4xf32>
    %35 = arith.addf %34, %33 : vector<1x4xf32>
    %36 = arith.divf %34, %35 : vector<1x4xf32>
    %37 = vector.broadcast %36 : vector<1x4xf32> to vector<8x4xf32>
    %38 = arith.mulf %37, %21 : vector<8x4xf32>
    %39 = arith.addf %2, %21 : vector<8x4xf32>
    %40 = arith.addf %19, %38 : vector<8x4xf32>
    %41 = arith.addf %17, %36 : vector<1x4xf32>
    %c0_11 = arith.constant 0 : index
    %c0_12 = arith.constant 0 : index
    %c0_13 = arith.constant 0 : index
    %42 = vector.load %arg6[%c0_11, %c0_12, %c0_13] : memref<1x8x4xf32, #tpu.memory_space<vmem>>, vector<1x8x4xf32>
    %43 = vector.shape_cast %42 : vector<1x8x4xf32> to vector<8x4xf32>
    %44 = vector.extract_strided_slice %0 {offsets = [2, 0], sizes = [1, 8], strides = [1, 1]} : vector<3x8xf32> to vector<1x8xf32>
    %45 = vector.shape_cast %44 : vector<1x8xf32> to vector<8xf32>
    %46 = vector.shape_cast %45 : vector<8xf32> to vector<8x1xf32>
    %47 = vector.broadcast %46 : vector<8x1xf32> to vector<8x4xf32>
    %48 = arith.mulf %43, %47 : vector<8x4xf32>
    %cst_14 = arith.constant dense<0.000000e+00> : vector<4xf32>
    %49 = vector.multi_reduction <add>, %48, %cst_14 [0] : vector<8x4xf32> to vector<4xf32>
    %50 = vector.shape_cast %49 : vector<4xf32> to vector<1x4xf32>
    %c2 = arith.constant 2 : index
    %51 = memref.load %arg3[%c2] : memref<3xf32, #tpu.memory_space<smem>>
    %52 = vector.broadcast %51 : f32 to vector<1x4xf32>
    %53 = arith.addf %50, %52 : vector<1x4xf32>
    %54 = arith.negf %53 : vector<1x4xf32>
    %55 = math.exp %54 : vector<1x4xf32>
    %cst_15 = arith.constant 1.000000e+00 : f32
    %56 = vector.broadcast %cst_15 : f32 to vector<1x4xf32>
    %57 = arith.addf %56, %55 : vector<1x4xf32>
    %58 = arith.divf %56, %57 : vector<1x4xf32>
    %59 = vector.broadcast %58 : vector<1x4xf32> to vector<8x4xf32>
    %60 = arith.mulf %59, %43 : vector<8x4xf32>
    %61 = arith.addf %39, %43 : vector<8x4xf32>
    %62 = arith.addf %40, %60 : vector<8x4xf32>
    %63 = arith.addf %41, %58 : vector<1x4xf32>
    %cst_16 = arith.constant 1.000000e+00 : f32
    %64 = vector.broadcast %cst_16 : f32 to vector<8x4xf32>
    %65 = arith.mulf %64, %62 : vector<8x4xf32>
    %66 = vector.broadcast %63 : vector<1x4xf32> to vector<8x4xf32>
    %67 = arith.mulf %66, %61 : vector<8x4xf32>
    %68 = arith.addf %65, %67 : vector<8x4xf32>
    %cst_17 = arith.constant 5.000000e-01 : f32
    %69 = vector.broadcast %cst_17 : f32 to vector<8x4xf32>
    %70 = arith.mulf %69, %68 : vector<8x4xf32>
    %c0_18 = arith.constant 0 : index
    %c0_19 = arith.constant 0 : index
    %c0_20 = arith.constant 0 : index
    %71 = vector.load %arg7[%c0_18, %c0_19, %c0_20] : memref<1x8x4xf32, #tpu.memory_space<vmem>>, vector<1x8x4xf32>
    %72 = vector.shape_cast %71 : vector<1x8x4xf32> to vector<8x4xf32>
    %73 = vector.shape_cast %70 : vector<8x4xf32> to vector<1x8x4xf32>
    tpu.vector_store %arg7[%c0_18, %c0_19, %c0_20], %73 {strides = array<i32>} : memref<1x8x4xf32, #tpu.memory_space<vmem>>, vector<1x8x4xf32>,
    return
  }
  func.func @transform_0(%arg0: i32, %arg1: i32) -> (i32, i32) {
    %c0_i32 = arith.constant 0 : i32
    %c0_i32_0 = arith.constant 0 : i32
    %c0_i32_1 = arith.constant 0 : i32
    return %c0_i32, %c0_i32_0 : i32, i32
  }
  func.func @transform_1(%arg0: i32, %arg1: i32) -> i32 {
    %c0_i32 = arith.constant 0 : i32
    %c0_i32_0 = arith.constant 0 : i32
    return %c0_i32 : i32
  }
  func.func @transform_2(%arg0: i32, %arg1: i32) -> (i32, i32, i32) {
    %c0_i32 = arith.constant 0 : i32
    %c0_i32_0 = arith.constant 0 : i32
    return %arg0, %c0_i32, %arg1 : i32, i32, i32
  }
  func.func @transform_3(%arg0: i32, %arg1: i32) -> (i32, i32, i32) {
    %c0_i32 = arith.constant 0 : i32
    %c0_i32_0 = arith.constant 0 : i32
    return %arg0, %c0_i32, %arg1 : i32, i32, i32
  }
  func.func @transform_4(%arg0: i32, %arg1: i32) -> (i32, i32, i32) {
    %c0_i32 = arith.constant 0 : i32
    %c0_i32_0 = arith.constant 0 : i32
    return %arg0, %c0_i32, %arg1 : i32, i32, i32
  }
  func.func @transform_5(%arg0: i32, %arg1: i32) -> (i32, i32, i32) {
    %c0_i32 = arith.constant 0 : i32
    %c0_i32_0 = arith.constant 0 : i32
    return %arg0, %c0_i32, %arg1 : i32, i32, i32
  }
}

</mosaic_0001>

<bundles_post_ra>
// kernel: tpu_custom_call.1
= control target key start
LH: loop header
LB: loop body
LE: loop exit
PB: predicated region body
PF: predicated region fallthrough
CT: control target
= control target key end

     0   :  { %10 = vsyncpa [#allocation3], 0  ;;  %s708_s18 = smov 0   ;;  %s710_s19 = smov 0   ;;  %s783_s0 = inlined_call_operand.vmem [shape: f32[3,8], index: 0, kind: input, shape index: {}]   ;;  %s784_s1 = inlined_call_operand.vmem [shape: f32[3], index: 1, kind: input, shape index: {}]   ;;  %s785_s2 = inlined_call_operand.vmem [shape: f32[2,8,4], index: 2, kind: input, shape index: {}]   ;;  %s786_s3 = inlined_call_operand.vmem [shape: f32[2,8,4], index: 3, kind: input, shape index: {}]   ;;  %s787_s4 = inlined_call_operand.vmem [shape: f32[2,8,4], index: 4, kind: input, shape index: {}]   ;;  %s788_s5 = inlined_call_operand.vmem [shape: f32[2,8,4], index: 5, kind: output, shape index: {}]  }
   0x1   :  { %s712_s20 = smov 0  }
   0x2 LB: > { %s567_s21 = sadd.s32 4294967295, %s675_s20   ;;  %s28_s22 = sadd.s32 1, %s671_s19  ;;  %s675_s20 = sphi %s712_s20, %s16_s20   ;;  %s671_s19 = sphi %s710_s19, %s790_s19   ;;  %s667_s18 = sphi %s708_s18, %s789_s18  }
   0x3   : > { %p30_p0 = scmp.ge.s32.totalorder %s28_s22, 2  ;;  %p569_p1 = scmp.ge.s32.totalorder %s675_s20, 1 }
   0x4   : > { %p187_p2 = scmp.lt.s32.totalorder %s675_s20, 3  ;;  %p593_p4 = scmp.eq.s32.totalorder %s567_s21, 0 }
   0x5   : > { %s792_s22 = smov (%p30_p0, %s28_s22), 0  ;;  %s202_s25 = sshll.u32 %s784_s1, 4  ;;  %s203_s25 = int_to_ptr.vmem [resolvable:$true] %s202_s25 }
   0x6   : > { %p188_p3 = pnand %p569_p1, %p187_p2  ;;  %s677_s26 = smov [#allocation2]  }
   0x8   : > { %p589_p5 = pneg %p188_p3  ;;  %245 = sbr.rel (%p188_p3) target bundleno = 207 (0xcf), region = 40 }
   0xa   : > { %p590_p6 = pnand %p593_p4, %p589_p5 }
   0xc   : > { %592 = dma.vmem_to_smem (!%p590_p6), %s203_s25, 16, %s677_s26, [#allocation3]  }
   0xd   : > { %662 = dma.done.wait (%p593_p4), [#allocation3], 16  }
   0xe   : > { %664 = vsyncadd (%p593_p4), [#allocation3], 4294967280 }
   0xf   : > { %252 = sfence }
  0x10   : > { %v324_v0 = vlaneseq  ;;  %v321_v2 = vld [vmem:[%s783_s0] sm:$0x7]  ;;  %p293_p7 = scmp.lt.s32.totalorder %s667_s18, 1  ;;  %vm331_vm0 = vcmask 31744   ;;  %s581_s14 = sld [smem:[#allocation2 + $0x2]] }
  0x11   : > { %v405_v3 = vperm.slane %v321_v2, 2  ;;  %v323_v4 = vperm.slane %v321_v2, 0  ;;  %v363_v5 = vperm.slane %v321_v2, 1  ;;  %s339_s15 = sld [smem:[#allocation2]] }
  0x12   : > { %v325_v1 = vshrl.u32 %v324_v0, 7  ;;  %s794_s18 = smov (!%p293_p7, %s667_s18), 1  ;;  %s579_s16 = sld [smem:[#allocation2 + $0x1]] }
  0x13   : > { %s737_s29 = sshll.u32 %s794_s18, 3 }
  0x14   : > { %621 = vset.pattern.permute.xlu1 %v325_v1  ;;  %620 = vset.pattern.permute.xlu0 %v325_v1  ;;  %s313_s7 = scalar_lea.vmem %s787_s4, %s737_s29  ;;  %s299_s10 = scalar_lea.vmem %s785_s2, %s737_s29 }
  0x15   : > { %v747_v6 = vld [vmem:[%s313_s7] sm:$0xff]  ;;  %s306_s13 = scalar_lea.vmem %s786_s3, %s737_s29  ;;  %s320_s21 = scalar_lea.vmem %s788_s5, %s737_s29 }
  0x16   : > { %v749_v7 = vld [vmem:[%s299_s10] sm:$0xff]  ;;  %v421_v29 = vstv %s581_s14 }
  0x17   : > { %v759_v18 = vld [vmem:[%s306_s13] sm:$0xff]  ;;  %v340_v30 = vstv %s339_s15 }
  0x18   : > { %v379_v41 = vstv %s579_s16 }
  0x1c   : > { %410 = vperm.xlu1 %621, %v405_v3   ;;  %328 = vperm.xlu0 %620, %v323_v4  }
  0x24   : > { %368 = vperm.xlu0 %620, %v363_v5  }
  0x8e   : > { %v411_v8 = vpop.permute.xlu1 %410  ;;  %v329_v9 = vpop.permute.xlu0 %328 }
  0x8f   : > { %v412_v10 = vmul.f32 %v411_v8, %v747_v6  ;;  %v330_v11 = vmul.f32 %v329_v9, %v749_v7 }
  0x91   : > { %v413_v12 = vsel %vm331_vm0, %v412_v10, 0.0  ;;  %v332_v13 = vsel %vm331_vm0, %v330_v11, 0.0  ;;  %v401_v11 = vadd.f32 %v759_v18, %v749_v7 }
  0x92   : > { %v414_v14 = vrot.slane %v413_v12, 4  ;;  %v333_v15 = vrot.slane %v332_v13, 4 }
  0x94   : > { %v415_v16 = vadd.f32 %v414_v14, %v413_v12  ;;  %v334_v17 = vadd.f32 %v333_v15, %v332_v13 }
  0x96   : > { %v416_v19 = vrot.slane %v415_v16, 2  ;;  %v335_v20 = vrot.slane %v334_v17, 2  ;;  %v369_v21 = vpop.permute.xlu0 %368 }
  0x97   : > { %v370_v22 = vmul.f32 %v369_v21, %v759_v18 }
  0x98   : > { %v417_v23 = vadd.f32 %v416_v19, %v415_v16  ;;  %v336_v24 = vadd.f32 %v335_v20, %v334_v17 }
  0x99   : > { %v371_v25 = vsel %vm331_vm0, %v370_v22, 0.0 }
  0x9a   : > { %v418_v26 = vrot.slane %v417_v23, 1  ;;  %v337_v27 = vrot.slane %v336_v24, 1  ;;  %v372_v28 = vrot.slane %v371_v25, 4 }
  0x9c   : > { %v419_v31 = vadd.f32 %v418_v26, %v417_v23  ;;  %v338_v32 = vadd.f32 %v337_v27, %v336_v24  ;;  %v373_v33 = vadd.f32 %v372_v28, %v371_v25  ;;  %v443_v24 = vadd.f32 %v747_v6, %v401_v11 }
  0x9e   : > { %v422_v34 = vadd.f32 %v421_v29, %v419_v31  ;;  %v341_v35 = vadd.f32 %v340_v30, %v338_v32  ;;  %v374_v36 = vrot.slane %v373_v33, 2 }
  0xa0   : > { %v582_v37 = vmul.f32 -1.442695, %v422_v34  ;;  %v578_v38 = vmul.f32 -1.442695, %v341_v35  ;;  %v375_v39 = vadd.f32 %v374_v36, %v373_v33 }
  0xa2   : > { %622 = vpow2.f32 %v582_v37  ;;  %v376_v40 = vrot.slane %v375_v39, 1 }
  0xa3   : > { %624 = vpow2.f32 %v578_v38 }
  0xa4   : > { %v377_v42 = vadd.f32 %v376_v40, %v375_v39 }
  0xa6   : > { %v380_v43 = vadd.f32 %v379_v41, %v377_v42 }
  0xa8   : > { %v623_v44 = vpop.eup %622  ;;  %v580_v45 = vmul.f32 -1.442695, %v380_v43 }
  0xa9   : > { %v625_v46 = vpop.eup %624  ;;  %v426_v47 = vadd.f32 1.0, %v623_v44 }
  0xaa   : > { %v345_v48 = vadd.f32 1.0, %v625_v46  ;;  %626 = vpow2.f32 %v580_v45 }
  0xab   : > { %628 = vrcp.f32 %v426_v47  ;;  %vm432_vm4 = vweird.f32 %v426_v47  ;;  %v436_v2 = vand.u32 2147483647, %v426_v47  ;;  %v438_v3 = vand.u32 2147483648, %v426_v47 }
  0xac   : > { %630 = vrcp.f32 %v345_v48  ;;  %vm351_vm2 = vweird.f32 %v345_v48  ;;  %v357_v62 = vand.u32 2147483648, %v345_v48  ;;  %v355_v0 = vand.u32 2147483647, %v345_v48 }
  0xad   : > { %v439_v14 = vor.u32 1.1754944e-38, %v438_v3  ;;  %vm437_vm11 = vcmp.eq.f32.partialorder %v436_v2, 8.507059e+37 }
  0xae   : > { %v358_v10 = vor.u32 1.1754944e-38, %v357_v62  ;;  %vm356_vm8 = vcmp.eq.f32.partialorder %v355_v0, 8.507059e+37 }
  0xb0   : > { %v627_v49 = vpop.eup %626 }
  0xb1   : > { %v629_v50 = vpop.eup %628  ;;  %v384_v51 = vadd.f32 1.0, %v627_v49 }
  0xb2   : > { %v631_v52 = vpop.eup %630  ;;  %v428_v53 = vmul.f32 %v629_v50, %v426_v47  ;;  %vm433_vm3 = vweird.f32 %v629_v50 }
  0xb3   : > { %v347_v54 = vmul.f32 %v631_v52, %v345_v48  ;;  %632 = vrcp.f32 %v384_v51  ;;  %vm352_vm1 = vweird.f32 %v631_v52  ;;  %v396_v4 = vand.u32 2147483648, %v384_v51  ;;  %vm434_vm7 = vmor %vm432_vm4, %vm433_vm3 }
  0xb4   : > { %v429_v55 = vsub.f32 1.0, %v428_v53  ;;  %vm353_vm5 = vmor %vm351_vm2, %vm352_vm1  ;;  %v394_v9 = vand.u32 2147483647, %v384_v51  ;;  %vm390_vm9 = vweird.f32 %v384_v51 }
  0xb5   : > { %v348_v56 = vsub.f32 1.0, %v347_v54  ;;  %v397_v16 = vor.u32 1.1754944e-38, %v396_v4 }
  0xb6   : > { %v430_v58 = vmul.f32 %v629_v50, %v429_v55  ;;  %vm395_vm12 = vcmp.eq.f32.partialorder %v394_v9, 8.507059e+37 }
  0xb7   : > { %v349_v57 = vmul.f32 %v631_v52, %v348_v56 }
  0xb8   : > { %v431_v63 = vadd.f32 %v629_v50, %v430_v58 }
  0xb9   : > { %v633_v59 = vpop.eup %632  ;;  %v350_v60 = vadd.f32 %v631_v52, %v349_v57 }
  0xba   : > { %v386_v61 = vmul.f32 %v633_v59, %v384_v51  ;;  %vm391_vm6 = vweird.f32 %v633_v59  ;;  %v435_v12 = vsel %vm434_vm7, %v629_v50, %v431_v63 }
  0xbb   : > { %v354_v5 = vsel %vm353_vm5, %v631_v52, %v350_v60  ;;  %vm392_vm10 = vmor %vm390_vm9, %vm391_vm6  ;;  %v440_v19 = vsel %vm437_vm11, %v439_v14, %v435_v12 }
  0xbc   : > { %v387_v1 = vsub.f32 1.0, %v386_v61  ;;  %v359_v15 = vsel %vm356_vm8, %v358_v10, %v354_v5  ;;  %v442_v25 = vmul.f32 %v440_v19, %v747_v6 }
  0xbd   : > { %v361_v21 = vmul.f32 %v359_v15, %v749_v7 }
  0xbe   : > { %v388_v8 = vmul.f32 %v633_v59, %v387_v1 }
  0xc0   : > { %v389_v13 = vadd.f32 %v633_v59, %v388_v8 }
  0xc2   : > { %v393_v17 = vsel %vm392_vm10, %v633_v59, %v389_v13 }
  0xc3   : > { %v398_v20 = vsel %vm395_vm12, %v397_v16, %v393_v17 }
  0xc4   : > { %v400_v22 = vmul.f32 %v398_v20, %v759_v18  ;;  %v403_v23 = vadd.f32 %v398_v20, %v359_v15 }
  0xc6   : > { %v402_v26 = vadd.f32 %v400_v22, %v361_v21  ;;  %v445_v27 = vadd.f32 %v440_v19, %v403_v23 }
  0xc8   : > { %v444_v28 = vadd.f32 %v442_v25, %v402_v26  ;;  %v446_v29 = vmul.f32 %v445_v27, %v443_v24 }
  0xca   : > { %v447_v30 = vadd.f32 %v446_v29, %v444_v28 }
  0xcc   : > { %v448_v31 = vmul.f32 0.5, %v447_v30 }
  0xce   : > { %449 = vst.msk [vmem:[%s320_s21] sm:$0xff] %vm331_vm0, %v448_v31 }
  0xcf PF: > { %s16_s20 = sadd.s32 1, %s675_s20   ;;  %s789_s18 = smov %s671_s19 }
  0xd0   : > { %p13_p8 = scmp.ge.s32.totalorder %s16_s20, 4   ;;  %s790_s19 = smov %s792_s22 }
  0xd2   :  { %15 = sbr.rel (!%p13_p8) target bundleno = 2 (0x2), region = 81 }
  0xd7   :  { %475 = vsyncpa [#allocation3], 1 }
  0xd8   :  { %477 = vsyncpa [#allocation3 + $0x1], 1 }

</bundles_post_ra>
